<compile_context>
chip_gen: v5e
topology: v5e:2x2
jax: 0.10.0
libtpu: 0.0.40
codegen_flags: <defaults>
</compile_context>

<pallas_src>
import jax
import jax.numpy as jnp
from jax.experimental import pallas as pl
from jax.experimental.pallas import tpu as pltpu

_LANES = 128
_TILE_BYTE_BUDGET = 2 * 1024 * 1024   # ~2 MiB/tile: amortizes ~0.35us/step overhead;
                                      # 4 double-buffered buffers (~8 MiB) fit every chip.
_MIN_PALLAS_ELEMENTS = 16384          # below this, launch latency dominates -> XLA fusion.


def _ceil_div(a, b):
    return -(-a // b)


def _round_up(a, b):
    return _ceil_div(a, b) * b


def _sublane_multiple(itemsize):
    # Packed-minimum second-minor tile: 8 rows (4B), 16 (2B), 32 (1B).
    if itemsize in (1, 2, 4):
        return 8 * (4 // itemsize)
    return 8


def _make_kernel(task, use_bias):
    def kernel(bias_ref, x_ref, o_ref):
        # bias_ref: SMEM (1,) f32 scalar; x_ref/o_ref: (tile_rows, 128) VMEM tiles.
        z = x_ref[...]
        if use_bias or task == "binary":
            z = z.astype(jnp.float32)          # fp32 bias-add / sigmoid precision
        if use_bias:
            z = z + bias_ref[0]
        if task == "binary":
            z = jax.nn.sigmoid(z)              # EUP-resident; free when HBM-bound
        o_ref[...] = z.astype(o_ref.dtype)

    return kernel


def prediction_layer(x, bias=None, task="binary", use_bias=True, force_pallas=False):
    """Pallas implementation of PredictionLayer.forward.

    x:    jnp.ndarray of any shape (typically [batch, 1] logits).
    bias: jnp.ndarray of shape (1,) (scalar bias); required if use_bias=True.
    force_pallas: skip the tiny-input XLA-fusion bypass (used for testing).
    """
    if task not in ("binary", "multiclass", "regression"):
        raise ValueError("task must be binary,multiclass or regression")

    x = jnp.asarray(x)
    orig_shape = x.shape
    dtype = x.dtype
    n = x.size

    if use_bias:
        if bias is None:
            raise ValueError("bias is required when use_bias=True")
        bias_f32 = jnp.asarray(bias, dtype=jnp.float32).reshape(1)
    else:
        bias_f32 = jnp.zeros((1,), dtype=jnp.float32)

    # ---- Tiny-input bypass: let XLA fuse the elementwise epilogue ----
    if n == 0 or (n < _MIN_PALLAS_ELEMENTS and not force_pallas):
        z = x
        if use_bias or task == "binary":
            z = z.astype(jnp.float32)
        if use_bias:
            z = z + bias_f32[0]
        if task == "binary":
            z = jax.nn.sigmoid(z)
        return z.astype(dtype)

    itemsize = dtype.itemsize
    sublane = _sublane_multiple(itemsize)
    rows = _ceil_div(n, _LANES)

    # Pad only when the flat size is not a multiple of the lane width (pad < 128 elems).
    padded = rows * _LANES
    x_flat = x.reshape(-1)
    was_padded = padded != n
    if was_padded:
        x_flat = jnp.pad(x_flat, (0, padded - n))
    x2d = x_flat.reshape(rows, _LANES)

    # ---- Tile selection: byte budget + dtype-aware sublane rounding ----
    budget_rows = max(sublane,
                      (_TILE_BYTE_BUDGET // (_LANES * itemsize)) // sublane * sublane)
    if rows <= sublane:
        # Single full-extent block (block_shape == array shape is always legal).
        tile_rows = rows
    elif rows <= budget_rows:
        # Split into >=2 tiles so the "parallel" axis can use both TCs on v7x.
        tile_rows = _round_up(_ceil_div(rows, 2), sublane)
    else:
        tile_rows = budget_rows
    grid = (_ceil_div(rows, tile_rows),)   # ragged last block handled by Pallas

    tile_bytes = tile_rows * _LANES * itemsize
    # Cover in+out double-buffering with headroom; tiny vs v5e 16 MiB / v7x 64 MiB.
    vmem_limit = int(min(max(6 * tile_bytes + (1 << 20), 8 << 20), 96 << 20))

    out2d = pl.pallas_call(
        _make_kernel(task, use_bias),
        out_shape=jax.ShapeDtypeStruct((rows, _LANES), dtype),
        grid=grid,
        in_specs=[
            pl.BlockSpec(memory_space=pltpu.SMEM),                 # scalar bias (f32)
            pl.BlockSpec((tile_rows, _LANES), lambda i: (i, 0)),   # lane-dense input tile
        ],
        out_specs=pl.BlockSpec((tile_rows, _LANES), lambda i: (i, 0)),
        compiler_params=pltpu.CompilerParams(
            dimension_semantics=("parallel",),   # independent tiles -> both TCs on v7x
            vmem_limit_bytes=vmem_limit,
        ),
    )(bias_f32, x2d)

    out_flat = out2d.reshape(-1)
    if was_padded:
        out_flat = out_flat[:n]
    return out_flat.reshape(orig_shape)


if __name__ == "__main__":
    key = jax.random.PRNGKey(0)
    k1, k2, k3 = jax.random.split(key, 3)

    # --- Case 1: typical tiny [batch, 1] logits, binary + bias (bypass path) ---
    x_small = jax.random.normal(k1, (8, 1), dtype=jnp.float32)
    bias0 = jnp.zeros((1,), dtype=jnp.float32)
    out1 = jax.block_until_ready(prediction_layer(x_small, bias0, task="binary", use_bias=True))
    ref1 = jax.nn.sigmoid(x_small + bias0[0])
    assert out1.shape == x_small.shape and out1.dtype == x_small.dtype
    assert jnp.allclose(out1, ref1, atol=1e-6, rtol=1e-6)

    # --- Case 2: same tiny input, forced through the Pallas path (single block) ---
    out2 = jax.block_until_ready(
        prediction_layer(x_small, bias0, task="binary", use_bias=True, force_pallas=True))
    assert out2.shape == x_small.shape and out2.dtype == x_small.dtype
    assert jnp.allclose(out2, ref1, atol=1e-6, rtol=1e-6)

    # --- Case 3: larger f32 input, ragged (non-multiple-of-128) size, multi-tile grid ---
    x_big = jax.random.normal(k2, (300, 257), dtype=jnp.float32)
    bias_big = jnp.array([0.1], dtype=jnp.float32)
    out3 = jax.block_until_ready(prediction_layer(x_big, bias_big, task="binary", use_bias=True))
    ref3 = jax.nn.sigmoid(x_big + bias_big[0])
    assert out3.shape == x_big.shape and out3.dtype == x_big.dtype
    assert jnp.allclose(out3, ref3, atol=1e-6, rtol=1e-6)

    # --- Case 4: regression / no bias -> exact identity copy through the kernel ---
    out4 = jax.block_until_ready(prediction_layer(x_big, task="regression", use_bias=False))
    assert out4.shape == x_big.shape and out4.dtype == x_big.dtype
    assert jnp.allclose(out4, x_big, atol=0.0, rtol=0.0)

    # --- Case 5: bf16 input (sublane multiple 16), nonzero bias, no pad needed ---
    x_bf16 = jax.random.normal(k3, (256, 128), dtype=jnp.bfloat16)
    bias_bf = jnp.array([0.25], dtype=jnp.float32)
    out5 = jax.block_until_ready(prediction_layer(x_bf16, bias_bf, task="binary", use_bias=True))
    ref5 = jax.nn.sigmoid(x_bf16.astype(jnp.float32) + bias_bf[0])
    assert out5.shape == x_bf16.shape and out5.dtype == x_bf16.dtype
    assert jnp.allclose(out5.astype(jnp.float32), ref5, atol=2e-2, rtol=2e-2)

    print("KERNEL_OK")
</pallas_src>

<mosaic_0001>
module attributes {stable_mosaic.version = 11 : i64} {
  func.func @kernel(%arg0: i32, %arg1: memref<1xf32, #tpu.memory_space<smem>>, %arg2: memref<1x128xf32, #tpu.memory_space<vmem>>, %arg3: memref<1x128xf32, #tpu.memory_space<vmem>>) attributes {dimension_semantics = [#tpu.dimension_semantics<parallel>], iteration_bounds = array<i64: 1>, scalar_prefetch = 0 : i64, scratch_operands = 0 : i64, tpu.core_type = #tpu.core_type<tc>, window_params = [{transform_indices = @transform_0, window_bounds = array<i64: 1>}, {transform_indices = @transform_1, window_bounds = array<i64: 1, 128>}, {transform_indices = @transform_2, window_bounds = array<i64: 1, 128>}]} {
    %c0 = arith.constant 0 : index
    %c0_0 = arith.constant 0 : index
    %0 = vector.load %arg2[%c0, %c0_0] : memref<1x128xf32, #tpu.memory_space<vmem>>, vector<1x128xf32>
    %c0_1 = arith.constant 0 : index
    %1 = memref.load %arg1[%c0_1] : memref<1xf32, #tpu.memory_space<smem>>
    %2 = vector.broadcast %1 : f32 to vector<1x128xf32>
    %3 = arith.addf %0, %2 : vector<1x128xf32>
    %4 = arith.negf %3 : vector<1x128xf32>
    %5 = math.exp %4 : vector<1x128xf32>
    %cst = arith.constant 1.000000e+00 : f32
    %6 = vector.broadcast %cst : f32 to vector<1x128xf32>
    %7 = arith.addf %6, %5 : vector<1x128xf32>
    %8 = arith.divf %6, %7 : vector<1x128xf32>
    %c0_2 = arith.constant 0 : index
    %c0_3 = arith.constant 0 : index
    %9 = vector.load %arg3[%c0_2, %c0_3] : memref<1x128xf32, #tpu.memory_space<vmem>>, vector<1x128xf32>
    tpu.vector_store %arg3[%c0_2, %c0_3], %8 {strides = array<i32>} : memref<1x128xf32, #tpu.memory_space<vmem>>, vector<1x128xf32>,
    return
  }
  func.func @transform_0(%arg0: i32) -> i32 {
    %c0_i32 = arith.constant 0 : i32
    %c0_i32_0 = arith.constant 0 : i32
    return %c0_i32 : i32
  }
  func.func @transform_1(%arg0: i32) -> (i32, i32) {
    %c0_i32 = arith.constant 0 : i32
    %c0_i32_0 = arith.constant 0 : i32
    return %arg0, %c0_i32 : i32, i32
  }
  func.func @transform_2(%arg0: i32) -> (i32, i32) {
    %c0_i32 = arith.constant 0 : i32
    %c0_i32_0 = arith.constant 0 : i32
    return %arg0, %c0_i32 : i32, i32
  }
}

</mosaic_0001>

<bundles_post_ra>
// kernel: tpu_custom_call.1
= control target key start
LH: loop header
LB: loop body
LE: loop exit
PB: predicated region body
PF: predicated region fallthrough
CT: control target
= control target key end

     0   :  { %s110_s0 = inlined_call_operand.<no memory space> [shape: f32[1], index: 0, kind: input, shape index: {}]   ;;  %s111_s1 = inlined_call_operand.vmem [shape: f32[1,128], index: 1, kind: input, shape index: {}]   ;;  %s112_s2 = inlined_call_operand.hbm [shape: f32[1,128], index: 2, kind: output, shape index: {}]  }
   0x1   :  { %v13_v0 = vld [vmem:[%s111_s1] sm:$0x1]  ;;  %v15_v1 = vstv %s110_s0 }
   0x2   :  { %8 = vsyncpa [#allocation4], 0  ;;  %v16_v2 = vadd.f32 %v15_v1, %v13_v0  ;;  %s85_s1 = smov [#allocation3]   ;;  %s44_s15 = sshll.u32 %s112_s2, 4  ;;  %s45_s15 = int_to_ptr.hbm [resolvable:$true] %s44_s15 }
   0x3   :  { %s42_s13 = sshll.u32 %s85_s1, 4  ;;  %s43_s13 = int_to_ptr.vmem [resolvable:$true] %s42_s13 }
   0x4   :  { %v53_v3 = vmul.f32 -1.442695, %v16_v2 }
   0x6   :  { %55 = vpow2.f32 %v53_v3 }
   0xc   :  { %v56_v4 = vpop.eup %55 }
   0xd   :  { %v20_v5 = vadd.f32 1.0, %v56_v4 }
   0xf   :  { %57 = vrcp.f32 %v20_v5  ;;  %v32_v8 = vand.u32 2147483648, %v20_v5  ;;  %vm26_vm0 = vweird.f32 %v20_v5  ;;  %v30_v10 = vand.u32 2147483647, %v20_v5 }
  0x11   :  { %v33_v12 = vor.u32 1.1754944e-38, %v32_v8  ;;  %vm31_vm3 = vcmp.eq.f32.partialorder %v30_v10, 8.507059e+37 }
  0x15   :  { %v58_v6 = vpop.eup %57 }
  0x16   :  { %v22_v7 = vmul.f32 %v58_v6, %v20_v5  ;;  %vm27_vm1 = vweird.f32 %v58_v6 }
  0x17   :  { %vm28_vm2 = vmor %vm26_vm0, %vm27_vm1 }
  0x18   :  { %v23_v9 = vsub.f32 1.0, %v22_v7 }
  0x1a   :  { %v24_v11 = vmul.f32 %v58_v6, %v23_v9 }
  0x1c   :  { %v25_v13 = vadd.f32 %v58_v6, %v24_v11 }
  0x1e   :  { %v29_v14 = vsel %vm28_vm2, %v58_v6, %v25_v13 }
  0x1f   :  { %v34_v15 = vsel %vm31_vm3, %v33_v12, %v29_v14 }
  0x20   :  { %36 = vst [vmem:[#allocation3] sm:$0x1] %v34_v15 }
  0x21   :  { %47 = dma.vmem_to_hbm [thread:$0]  %s43_s13, 16, %s45_s15, [#allocation4]  }
  0x22   :  { %83 = dma.done.wait [#allocation4], 16  }
  0x23   :  { %84 = vsyncadd [#allocation4], 4294967280 }
  0x24   :  { %52 = vsyncpa [#allocation4], 1 }

</bundles_post_ra>
